<compile_context>
chip_gen: v5e
topology: v5e:2x2
jax: 0.10.0
libtpu: 0.0.40
codegen_flags: <defaults>
</compile_context>

<pallas_src>
import functools
import math

import jax
import jax.numpy as jnp
from jax.experimental import pallas as pl
from jax.experimental.pallas import tpu as pltpu

LN_EPS = 1e-5


def _round_up(a, b):
    return (a + b - 1) // b * b


def _vmem_limit_bytes():
    try:
        cap = int(pltpu.get_tpu_info().vmem_capacity_bytes)
    except Exception:
        cap = 64 * 1024 * 1024  # conservative fallback (v7x physical VMEM)
    # ~100 MiB on 128 MiB parts (v5e/v6e), ~51 MiB on 64 MiB parts (v7x).
    return min(int(cap * 0.8), 100 * 1024 * 1024)


def _ln_silu_epilogue(y, c_ref, inv_n):
    """y: (tm, OUT_pad) f32 pre-bias activations; padded output columns are exactly 0."""
    c = c_ref[...].astype(jnp.float32)
    y = y + c[0:1, :]  # bias (padded with 0 -> pad columns stay exactly 0)
    # One-pass LayerNorm statistics over valid columns (pad columns contribute 0).
    s1 = jnp.sum(y, axis=-1, keepdims=True)
    s2 = jnp.sum(y * y, axis=-1, keepdims=True)
    mean = s1 * inv_n
    var = jnp.maximum(s2 * inv_n - mean * mean, 0.0)
    z = (y - mean) * jax.lax.rsqrt(var + LN_EPS) * c[1:2, :] + c[2:3, :]
    return z * jax.nn.sigmoid(z)  # SiLU


def _fast_kernel(x_ref, w_ref, c_ref, o_ref, *, inv_n, precision):
    # Single K block, single N block: no accumulator round trip.
    y = jnp.dot(x_ref[...], w_ref[...],
                preferred_element_type=jnp.float32, precision=precision)
    o_ref[...] = _ln_silu_epilogue(y, c_ref, inv_n).astype(o_ref.dtype)


def _general_kernel(x_ref, w_ref, c_ref, o_ref, acc_ref, *, inv_n, precision):
    # grid = (M_tiles, N_tiles, K_tiles); K is the innermost (reduction) axis.
    n = pl.program_id(1)
    k = pl.program_id(2)
    tn = w_ref.shape[1]
    off = pl.multiple_of(n * tn, 128)

    part = jnp.dot(x_ref[...], w_ref[...],
                   preferred_element_type=jnp.float32, precision=precision)

    @pl.when(k == 0)
    def _assign():
        acc_ref[:, pl.ds(off, tn)] = part  # no separate zero-init pass

    @pl.when(k != 0)
    def _accumulate():
        acc_ref[:, pl.ds(off, tn)] += part

    @pl.when(jnp.logical_and(n == pl.num_programs(1) - 1,
                             k == pl.num_programs(2) - 1))
    def _finalize():
        o_ref[...] = _ln_silu_epilogue(acc_ref[...], c_ref, inv_n).astype(o_ref.dtype)


def prepare_params(w, b, gamma, beta, *, param_dtype=None):
    """Pad parameters once (hoisted out of the per-call path) and fold b/gamma/beta."""
    in_features, out_features = w.shape
    K_pad = _round_up(in_features, 128)
    OUT_pad = _round_up(out_features, 128)
    if K_pad != in_features or OUT_pad != out_features:
        wp = jnp.pad(w, ((0, K_pad - in_features), (0, OUT_pad - out_features)))
    else:
        wp = w
    if param_dtype is not None:
        wp = wp.astype(param_dtype)
    pad_n = OUT_pad - out_features
    consts = jnp.stack(
        [
            jnp.pad(b.astype(jnp.float32), (0, pad_n)),
            jnp.pad(gamma.astype(jnp.float32), (0, pad_n), constant_values=1.0),
            jnp.pad(beta.astype(jnp.float32), (0, pad_n)),
        ],
        axis=0,
    )  # (3, OUT_pad) f32
    return {"wp": wp, "consts": consts,
            "in_features": in_features, "out_features": out_features}


def linear_block_apply(params, x, *, tile_m=256):
    """x: [..., in_features] -> [..., out_features], fused Linear+LayerNorm+SiLU."""
    wp, consts = params["wp"], params["consts"]
    in_features = params["in_features"]
    out_features = params["out_features"]
    K_pad, OUT_pad = wp.shape

    lead = x.shape[:-1]
    M = math.prod(lead) if lead else 1
    x2d = x.reshape(M, in_features)

    dt = jnp.dtype(x.dtype)
    itemsize = dt.itemsize
    w_itemsize = jnp.dtype(wp.dtype).itemsize
    sub = {2: 16, 1: 32}.get(itemsize, 8)  # packed-sublane alignment per dtype

    vmem_limit = _vmem_limit_bytes()

    # ---- tile sizes ---------------------------------------------------------
    # Row tile: large (the weight is re-streamed once per row tile), sublane aligned.
    tm = _round_up(min(tile_m, max(M, sub)), sub)
    # Small-M: keep at least 2 row tiles so a 2-TensorCore chip can split the M axis.
    if M >= 2 * sub and _round_up(M, tm) // tm < 2:
        tm = _round_up((M + 1) // 2, sub)

    # Reduction tile (lane aligned); larger tk -> fewer accumulator RMW passes.
    tk_cap = 1024 if itemsize <= 2 else 512
    if K_pad <= tk_cap:
        tk = K_pad
    else:
        tk = 128
        for cand in range(tk_cap, 0, -128):
            if K_pad % cand == 0:
                tk = cand
                break

    # Output-feature tile: single block when narrow; otherwise <=1024-wide slices so
    # the weight double-buffer does not scale with OUT_pad.
    if OUT_pad <= 2048:
        tn = OUT_pad
    else:
        tn = 128
        for cand in range(1024, 0, -128):
            if OUT_pad % cand == 0:
                tn = cand
                break

    # Shrink tm only if the real per-step footprint overflows the VMEM budget.
    def footprint(tm_):
        return (2 * tm_ * tk * itemsize          # x double-buffer
                + 2 * tk * tn * w_itemsize       # w double-buffer
                + 2 * tm_ * OUT_pad * itemsize   # out double-buffer
                + tm_ * OUT_pad * 4              # f32 accumulator
                + 2 * 3 * OUT_pad * 4)           # consts
    while footprint(tm) > vmem_limit * 3 // 4 and tm > sub:
        tm = max(sub, _round_up(tm // 2, sub))

    M_pad = _round_up(M, tm)
    m_tiles = M_pad // tm
    n_tiles = OUT_pad // tn
    k_tiles = K_pad // tk

    # Pad x only when actually required.
    if M_pad != M or K_pad != in_features:
        xp = jnp.pad(x2d, ((0, M_pad - M), (0, K_pad - in_features)))
    else:
        xp = x2d

    precision = jax.lax.Precision.HIGHEST if dt == jnp.float32 else None
    inv_n = 1.0 / float(out_features)

    out_bytes = M_pad * OUT_pad * itemsize
    const_bytes = consts.size * 4

    if n_tiles == 1 and k_tiles == 1:
        # Fast path: no accumulator, weight VMEM-resident across row tiles.
        kernel = functools.partial(_fast_kernel, inv_n=inv_n, precision=precision)
        cost = pl.CostEstimate(
            flops=2 * M_pad * K_pad * OUT_pad,
            transcendentals=M_pad * OUT_pad,
            bytes_accessed=int(xp.size * itemsize + wp.size * w_itemsize
                               + const_bytes + out_bytes),
        )
        out2d = pl.pallas_call(
            kernel,
            out_shape=jax.ShapeDtypeStruct((M_pad, OUT_pad), x.dtype),
            grid_spec=pltpu.PrefetchScalarGridSpec(
                num_scalar_prefetch=0,
                grid=(m_tiles,),
                in_specs=[
                    pl.BlockSpec((tm, K_pad), lambda i: (i, 0)),
                    pl.BlockSpec((K_pad, OUT_pad), lambda i: (0, 0)),
                    pl.BlockSpec((3, OUT_pad), lambda i: (0, 0)),
                ],
                out_specs=pl.BlockSpec((tm, OUT_pad), lambda i: (i, 0)),
            ),
            compiler_params=pltpu.CompilerParams(
                dimension_semantics=("parallel",),
                vmem_limit_bytes=vmem_limit,
            ),
            cost_estimate=cost,
        )(xp, wp, consts)
    else:
        kernel = functools.partial(_general_kernel, inv_n=inv_n, precision=precision)
        cost = pl.CostEstimate(
            flops=2 * M_pad * K_pad * OUT_pad,
            transcendentals=M_pad * OUT_pad,
            bytes_accessed=int(xp.size * itemsize * n_tiles      # x re-streamed per N tile
                               + wp.size * w_itemsize * m_tiles  # w re-streamed per row tile
                               + const_bytes + out_bytes),
        )
        out2d = pl.pallas_call(
            kernel,
            out_shape=jax.ShapeDtypeStruct((M_pad, OUT_pad), x.dtype),
            grid_spec=pltpu.PrefetchScalarGridSpec(
                num_scalar_prefetch=0,
                grid=(m_tiles, n_tiles, k_tiles),
                in_specs=[
                    pl.BlockSpec((tm, tk), lambda i, n, k: (i, k)),
                    pl.BlockSpec((tk, tn), lambda i, n, k: (k, n)),
                    pl.BlockSpec((3, OUT_pad), lambda i, n, k: (0, 0)),
                ],
                out_specs=pl.BlockSpec((tm, OUT_pad), lambda i, n, k: (i, 0)),
                scratch_shapes=[pltpu.VMEM((tm, OUT_pad), jnp.float32)],
            ),
            compiler_params=pltpu.CompilerParams(
                dimension_semantics=("parallel", "arbitrary", "arbitrary"),
                vmem_limit_bytes=vmem_limit,
            ),
            cost_estimate=cost,
        )(xp, wp, consts)

    return out2d[:M, :out_features].reshape(*lead, out_features)


def linear_block_forward(x, w, b, gamma, beta, *, tile_m=256):
    """Convenience wrapper (pads parameters per call; prefer prepare_params + apply)."""
    return linear_block_apply(prepare_params(w, b, gamma, beta), x, tile_m=tile_m)


def _reference(x, w, b, gamma, beta):
    y = x.astype(jnp.float32) @ w.astype(jnp.float32) + b
    mean = jnp.mean(y, axis=-1, keepdims=True)
    var = jnp.mean((y - mean) ** 2, axis=-1, keepdims=True)
    z = (y - mean) * jax.lax.rsqrt(var + LN_EPS) * gamma + beta
    return z * jax.nn.sigmoid(z)


if __name__ == "__main__":
    batch, seq, in_features, out_features = 2, 8, 32, 64

    key = jax.random.PRNGKey(0)
    kx, kw, kb = jax.random.split(key, 3)

    x = jax.random.normal(kx, (batch, seq, in_features), dtype=jnp.float32)

    # Deterministic parameter init (mimics nn.Linear's uniform(-1/sqrt(in), 1/sqrt(in)))
    bound = 1.0 / (in_features ** 0.5)
    w = jax.random.uniform(kw, (in_features, out_features), jnp.float32, -bound, bound)
    b = jax.random.uniform(kb, (out_features,), jnp.float32, -bound, bound)
    # nn.LayerNorm default affine init
    gamma = jnp.ones((out_features,), jnp.float32)
    beta = jnp.zeros((out_features,), jnp.float32)

    # Pad parameters once (hoisted out of the per-call path), then apply.
    params = prepare_params(w, b, gamma, beta)
    out = linear_block_apply(params, x)
    out = jax.block_until_ready(out)

    ref = _reference(x, w, b, gamma, beta)
    assert out.shape == (batch, seq, out_features)
    assert jnp.allclose(out, ref, atol=1e-4, rtol=1e-4)

    print("KERNEL_OK")
</pallas_src>

<mosaic_0001>
module attributes {stable_mosaic.version = 11 : i64} {
  func.func @_fast_kernel(%arg0: i32, %arg1: memref<8x128xf32, #tpu.memory_space<vmem>>, %arg2: memref<128x128xf32, #tpu.memory_space<vmem>>, %arg3: memref<3x128xf32, #tpu.memory_space<vmem>>, %arg4: memref<8x128xf32, #tpu.memory_space<vmem>>) attributes {dimension_semantics = [#tpu.dimension_semantics<parallel>], iteration_bounds = array<i64: 2>, scalar_prefetch = 0 : i64, scratch_operands = 0 : i64, tpu.core_type = #tpu.core_type<tc>, window_params = [{transform_indices = @transform_0, window_bounds = array<i64: 8, 128>}, {pipeline_mode = #tpu.pipeline_mode<synchronous>, transform_indices = @transform_1, window_bounds = array<i64: 128, 128>}, {pipeline_mode = #tpu.pipeline_mode<synchronous>, transform_indices = @transform_2, window_bounds = array<i64: 3, 128>}, {transform_indices = @transform_3, window_bounds = array<i64: 8, 128>}]} {
    %c0 = arith.constant 0 : index
    %c0_0 = arith.constant 0 : index
    %0 = vector.load %arg1[%c0, %c0_0] : memref<8x128xf32, #tpu.memory_space<vmem>>, vector<8x128xf32>
    %c0_1 = arith.constant 0 : index
    %c0_2 = arith.constant 0 : index
    %1 = vector.load %arg2[%c0_1, %c0_2] : memref<128x128xf32, #tpu.memory_space<vmem>>, vector<128x128xf32>
    %cst = arith.constant dense<0.000000e+00> : vector<8x128xf32>
    %2 = tpu.matmul %0, %1, %cst {dimension_numbers = #tpu.dot_dimension_numbers<[1], [0], [0], [1], [0, 0, 1, 1], [], []>, precision = #tpu.contract_precision<fp32>} : vector<8x128xf32>, vector<128x128xf32>, vector<8x128xf32> -> vector<8x128xf32>
    %c0_3 = arith.constant 0 : index
    %c0_4 = arith.constant 0 : index
    %3 = vector.load %arg3[%c0_3, %c0_4] : memref<3x128xf32, #tpu.memory_space<vmem>>, vector<3x128xf32>
    %4 = vector.extract_strided_slice %3 {offsets = [0, 0], sizes = [1, 128], strides = [1, 1]} : vector<3x128xf32> to vector<1x128xf32>
    %5 = vector.broadcast %4 : vector<1x128xf32> to vector<8x128xf32>
    %6 = arith.addf %2, %5 : vector<8x128xf32>
    %cst_5 = arith.constant dense<0.000000e+00> : vector<8xf32>
    %7 = vector.multi_reduction <add>, %6, %cst_5 [1] : vector<8x128xf32> to vector<8xf32>
    %8 = vector.shape_cast %7 : vector<8xf32> to vector<8x1xf32>
    %9 = arith.mulf %6, %6 : vector<8x128xf32>
    %cst_6 = arith.constant dense<0.000000e+00> : vector<8xf32>
    %10 = vector.multi_reduction <add>, %9, %cst_6 [1] : vector<8x128xf32> to vector<8xf32>
    %11 = vector.shape_cast %10 : vector<8xf32> to vector<8x1xf32>
    %cst_7 = arith.constant 1.562500e-02 : f32
    %12 = vector.broadcast %cst_7 : f32 to vector<8x1xf32>
    %13 = arith.mulf %8, %12 : vector<8x1xf32>
    %cst_8 = arith.constant 1.562500e-02 : f32
    %14 = vector.broadcast %cst_8 : f32 to vector<8x1xf32>
    %15 = arith.mulf %11, %14 : vector<8x1xf32>
    %16 = arith.mulf %13, %13 : vector<8x1xf32>
    %17 = arith.subf %15, %16 : vector<8x1xf32>
    %cst_9 = arith.constant 0.000000e+00 : f32
    %18 = vector.broadcast %cst_9 : f32 to vector<8x1xf32>
    %19 = arith.maximumf %17, %18 : vector<8x1xf32>
    %20 = vector.broadcast %13 : vector<8x1xf32> to vector<8x128xf32>
    %21 = arith.subf %6, %20 : vector<8x128xf32>
    %cst_10 = arith.constant 9.99999974E-6 : f32
    %22 = vector.broadcast %cst_10 : f32 to vector<8x1xf32>
    %23 = arith.addf %19, %22 : vector<8x1xf32>
    %24 = math.rsqrt %23 : vector<8x1xf32>
    %25 = vector.broadcast %24 : vector<8x1xf32> to vector<8x128xf32>
    %26 = arith.mulf %21, %25 : vector<8x128xf32>
    %27 = vector.extract_strided_slice %3 {offsets = [1, 0], sizes = [1, 128], strides = [1, 1]} : vector<3x128xf32> to vector<1x128xf32>
    %28 = vector.broadcast %27 : vector<1x128xf32> to vector<8x128xf32>
    %29 = arith.mulf %26, %28 : vector<8x128xf32>
    %30 = vector.extract_strided_slice %3 {offsets = [2, 0], sizes = [1, 128], strides = [1, 1]} : vector<3x128xf32> to vector<1x128xf32>
    %31 = vector.broadcast %30 : vector<1x128xf32> to vector<8x128xf32>
    %32 = arith.addf %29, %31 : vector<8x128xf32>
    %33 = arith.negf %32 : vector<8x128xf32>
    %34 = math.exp %33 : vector<8x128xf32>
    %cst_11 = arith.constant 1.000000e+00 : f32
    %35 = vector.broadcast %cst_11 : f32 to vector<8x128xf32>
    %36 = arith.addf %35, %34 : vector<8x128xf32>
    %37 = arith.divf %35, %36 : vector<8x128xf32>
    %38 = arith.mulf %32, %37 : vector<8x128xf32>
    %c0_12 = arith.constant 0 : index
    %c0_13 = arith.constant 0 : index
    %39 = vector.load %arg4[%c0_12, %c0_13] : memref<8x128xf32, #tpu.memory_space<vmem>>, vector<8x128xf32>
    tpu.vector_store %arg4[%c0_12, %c0_13], %38 {strides = array<i32>} : memref<8x128xf32, #tpu.memory_space<vmem>>, vector<8x128xf32>,
    return
  }
  func.func @transform_0(%arg0: i32) -> (i32, i32) {
    %c0_i32 = arith.constant 0 : i32
    %c0_i32_0 = arith.constant 0 : i32
    return %arg0, %c0_i32 : i32, i32
  }
  func.func @transform_1(%arg0: i32) -> (i32, i32) {
    %c0_i32 = arith.constant 0 : i32
    %c0_i32_0 = arith.constant 0 : i32
    %c0_i32_1 = arith.constant 0 : i32
    return %c0_i32, %c0_i32_0 : i32, i32
  }
  func.func @transform_2(%arg0: i32) -> (i32, i32) {
    %c0_i32 = arith.constant 0 : i32
    %c0_i32_0 = arith.constant 0 : i32
    %c0_i32_1 = arith.constant 0 : i32
    return %c0_i32, %c0_i32_0 : i32, i32
  }
  func.func @transform_3(%arg0: i32) -> (i32, i32) {
    %c0_i32 = arith.constant 0 : i32
    %c0_i32_0 = arith.constant 0 : i32
    return %arg0, %c0_i32 : i32, i32
  }
}

</mosaic_0001>

<bundles_post_ra>
// kernel: tpu_custom_call.1
= control target key start
LH: loop header
LB: loop body
LE: loop exit
PB: predicated region body
PF: predicated region fallthrough
CT: control target
= control target key end

     0   :  { %8 = vsyncpa [#allocation3], 0  ;;  %s1400_s0 = inlined_call_operand.hbm [shape: f32[16,128], index: 0, kind: input, shape index: {}]   ;;  %s1401_s1 = inlined_call_operand.hbm [shape: f32[128,128], index: 1, kind: input, shape index: {}]   ;;  %s1402_s2 = inlined_call_operand.hbm [shape: f32[3,128], index: 2, kind: input, shape index: {}]   ;;  %s1403_s3 = inlined_call_operand.hbm [shape: f32[16,128], index: 3, kind: output, shape index: {}]  }
   0x1   :  { %10 = vsyncpa [#allocation3 + $0x1], 0 }
   0x2   :  { %11 = vsyncpa [#allocation6], 0 }
   0x3   :  { %12 = vsyncpa [#allocation4], 0 }
   0x4   :  { %14 = vsyncpa [#allocation4 + $0x1], 0  ;;  %s1010_s12 = smov 0   ;;  %s1012_s13 = smov 0  }
   0x5   :  { %s1014_s14 = smov 0   ;;  %s1016_s15 = smov 0  }
   0x6 LB: > { %s130_s18 = sshll.u32 %s1401_s1, 4  ;;  %s1034_s19 = sadd.s32 4294967295, %s984_s15   ;;  %s984_s15 = sphi %s1016_s15, %s1414_s15   ;;  %s980_s14 = sphi %s1014_s14, %s1413_s14   ;;  %s976_s13 = sphi %s1012_s13, %s1412_s13   ;;  %s972_s12 = sphi %s1010_s12, %s1411_s12   ;;  %s131_s18 = int_to_ptr.hbm [resolvable:$true] %s130_s18 }
   0x7   : > { %p733_p0 = scmp.ge.s32.totalorder %s984_s15, 1  ;;  %p41_p1 = scmp.eq.s32.totalorder %s1034_s19, 0 }
   0x8   : > { %p119_p2 = scmp.lt.s32.totalorder %s984_s15, 3  ;;  %s986_s21 = smov [#allocation5]  }
   0x9   : > { %s132_s22 = sshll.u32 %s986_s21, 4  ;;  %s145_s25 = sshll.u32 %s1402_s2, 4  ;;  %s133_s22 = int_to_ptr.vmem [resolvable:$true] %s132_s22  ;;  %s146_s25 = int_to_ptr.hbm [resolvable:$true] %s145_s25 }
   0xa   : > { %p1039_p3 = pnand %p733_p0, %p119_p2  ;;  %s987_s26 = smov [#allocation7]  }
   0xb   : > { %s147_s27 = sshll.u32 %s987_s26, 4  ;;  %s988_s28 = smov 128   ;;  %s148_s27 = int_to_ptr.vmem [resolvable:$true] %s147_s27 }
   0xc   : > { %p761_p4 = pneg %p1039_p3  ;;  %s989_s29 = smov 8  }
   0xd   : > { %s732_s30 = sadd.s32 4294967294, %s984_s15   ;;  %s1053_s4 = sadd.s32 1, %s984_s15  }
   0xe   : > { %p762_p6 = pnand %p761_p4, %p41_p1  ;;  %s24_s5 = ssub.s32 %s984_s15, %s1053_s4 }
   0xf   : > { %s27_s6 = sadd.s32 1, %s980_s14  ;;  %p25_p7 = scmp.eq.s32.totalorder %s24_s5, 0 }
  0x10   : > { %764 = dma.hbm_to_vmem [thread:$0]  (!%p762_p6), %s131_s18, 2048, %s133_s22, [#allocation6], %s988_s28, %s988_s28, %s989_s29  }
  0x11   : > { %767 = dma.hbm_to_vmem [thread:$0]  (!%p762_p6), %s146_s25, 64, %s148_s27, [#allocation6]  }
  0x12   : > { %p34_p8 = scmp.ne.s32.totalorder %s980_s14, %s976_s13  ;;  %p35_p9 = scmp.eq.s32.totalorder %s984_s15, 0 }
  0x13   : > { %p40_p10 = scmp.ne.s32.totalorder %s976_s13, %s972_s12  ;;  %p106_p13 = scmp.eq.s32.totalorder %s1034_s19, 1 }
  0x14   : > { %s1064_s7 = scalar_select %p25_p7, %s980_s14, %s27_s6  }
  0x15   : > { %p1066_p11 = por %p35_p9, %p34_p8  ;;  %p1072_p12 = por %p41_p1, %p40_p10 }
  0x16   : > { %p112_p0 = scmp.eq.s32.totalorder %s732_s30, 1  ;;  %p778_p2 = scmp.lt.s32.totalorder %s984_s15, 2 }
  0x17   : > { %s158_s10 = sand.u32 1, %s980_s14   ;;  %p1079_p4 = por %p106_p13, %p34_p8 }
  0x18   : > { %p1083_p6 = por %p112_p0, %p40_p10  ;;  %s737_s17 = sshll.u32 %s158_s10, 3 }
  0x19   : > { %s738_s18 = sshll.u32 %s984_s15, 3  ;;  %s162_s24 = scalar_lea.vmem [#allocation2], %s737_s17 }
  0x1a   : > { %s166_s23 = scalar_lea.hbm %s1400_s0, %s738_s18  ;;  %s170_s25 = sshll.u32 %s162_s24, 4  ;;  %s171_s25 = int_to_ptr.vmem [resolvable:$true] %s170_s25 }
  0x1b   : > { %s168_s26 = sshll.u32 %s166_s23, 4  ;;  %p1093_p7 = pnand %p778_p2, %p1066_p11  ;;  %s169_s26 = int_to_ptr.hbm [resolvable:$true] %s168_s26 }
  0x1c   : > { %s159_s28 = scalar_lea.sflag [#allocation3], %s158_s10  ;;  %s884_s29 = sshra.s32 %s169_s26, 4  ;;  %s885_s29 = int_to_ptr.hbm [resolvable:$true] %s884_s29 }
  0x1d   : > { %s886_s30 = scalar_lea.hbm %s885_s29, 8  ;;  %p888_p9 = pneg %p1093_p7 }
  0x1e   : > { %p887_p8 = scmp.ne.s32.totalorder %s885_s29, %s886_s30  ;;  %s891_s17 = scalar_lea.hbm %s1400_s0, 16 }
  0x1f   : > { %p892_p11 = scmp.lt.s32.totalorder %s885_s29, %s1400_s0  ;;  %p893_p0 = scmp.lt.s32.totalorder %s891_s17, %s886_s30 }
  0x20   : > { %p889_p10 = pnand %p888_p9, %p887_p8 }
  0x21   : > { %p894_p2 = por %p893_p0, %p892_p11 }
  0x22   : > { %p890_p13 = pneg %p889_p10 }
  0x24   : > { %p895_p5 = pnand %p894_p2, %p890_p13 }
  0x26   : > { %898 = shalt.err (!%p895_p5)
}
  0x27   : > { %771 = dma.hbm_to_vmem [thread:$0]  (!%p1093_p7), %s169_s26, 128, %s171_s25, %s159_s28  }
  0x28   : > { %179 = sbr.rel (%p1039_p3) target bundleno = 439 (0x1b7), region = 32  ;;  %s1110_s10 = sand.u32 (!%p1039_p3), 1, %s976_s13  }
  0x29   : > { %s740_s21 = sshll.u32 (!%p1039_p3), %s1110_s10, 3  ;;  %s182_s22 = scalar_lea.sflag (!%p1039_p3), [#allocation3], %s1110_s10 }
  0x2a   : > { %s1116_s23 = scalar_lea.vmem (!%p1039_p3), [#allocation2], %s740_s21 }
  0x2d   : > { %959 = dma.done.wait (%p1072_p12), %s182_s22, 128  }
  0x2e   : > { %961 = vsyncadd (%p1072_p12), %s182_s22, 4294967168 }
  0x2f   : > { %963 = dma.done.wait (%p41_p1), [#allocation6], 2112  }
  0x30   : > { %965 = vsyncadd (%p41_p1), [#allocation6], 4294965184  ;;  %v235_v0 = vld [vmem:[#allocation5 + $0x78] sm:$0xff]  ;;  %v234_v1 = vld [vmem:[#allocation5 + $0x70] sm:$0xff]  ;;  %s746_s20 = sshll.u32 %s1034_s19, 3  ;;  %s218_s26 = scalar_lea.vmem [#allocation8], %s740_s21 }
  0x31   : > { %v233_v2 = vld [vmem:[#allocation5 + $0x68] sm:$0xff]  ;;  %v1126_v3 = vand.u32 4294901760, %v235_v0  ;;  %v1128_v4 = vand.u32 4294901760, %v234_v1  ;;  %v232_v6 = vld [vmem:[#allocation5 + $0x60] sm:$0xff]  ;;  %v231_v7 = vld [vmem:[#allocation5 + $0x58] sm:$0xff]  ;;  %s638_s25 = scalar_lea.hbm %s1403_s3, %s746_s20  ;;  %s640_s27 = sshll.u32 %s218_s26, 4  ;;  %s641_s27 = int_to_ptr.vmem [resolvable:$true] %s640_s27 }
  0x32   : > { %v1130_v5 = vand.u32 4294901760, %v233_v2  ;;  %v230_v8 = vld [vmem:[#allocation5 + $0x50] sm:$0xff]  ;;  %v1132_v9 = vand.u32 4294901760, %v232_v6  ;;  %v1134_v10 = vand.u32 4294901760, %v231_v7  ;;  %v229_v12 = vld [vmem:[#allocation5 + $0x48] sm:$0xff]  ;;  %v228_v13 = vld [vmem:[#allocation5 + $0x40] sm:$0xff] }
  0x33   : > { %v1136_v11 = vand.u32 4294901760, %v230_v8  ;;  %239 = vmatpush.msra.mxu0 %v1126_v3  ;;  %v1140_v14 = vsub.f32 %v235_v0, %v1126_v3  ;;  %v1143_v15 = vsub.f32 %v234_v1, %v1128_v4  ;;  %v1148_v17 = vand.u32 4294901760, %v229_v12  ;;  %435 = vmatpush.msra.mxu3 %v1126_v3  ;;  %v227_v21 = vld [vmem:[#allocation5 + $0x38] sm:$0xff]  ;;  %v226_v34 = vld [vmem:[#allocation5 + $0x30] sm:$0xff]  ;;  %v225_v35 = vld [vmem:[#allocation5 + $0x28] sm:$0xff]  ;;  %s642_s28 = sshll.u32 %s638_s25, 4  ;;  %s643_s28 = int_to_ptr.hbm [resolvable:$true] %s642_s28 }
  0x34   : > { %v1146_v16 = vsub.f32 %v233_v2, %v1130_v5  ;;  %v1152_v18 = vsub.f32 %v232_v6, %v1132_v9  ;;  %v1155_v19 = vsub.f32 %v231_v7, %v1134_v10  ;;  %v1157_v20 = vand.u32 4294901760, %v228_v13  ;;  %v224_v42 = vld [vmem:[#allocation5 + $0x20] sm:$0xff]  ;;  %v223_v47 = vld [vmem:[#allocation5 + $0x18] sm:$0xff]  ;;  %v222_v53 = vld [vmem:[#allocation5 + $0x10] sm:$0xff]  ;;  %s628_s19 = scalar_lea.sflag [#allocation4], %s1110_s10  ;;  %s928_s29 = sshra.s32 %s643_s28, 4  ;;  %s929_s29 = int_to_ptr.hbm [resolvable:$true] %s928_s29 }
  0x35   : > { %241 = vmatpush.msra.mxu0 %v1128_v4  ;;  %v281_v22 = vand.u32 4294901760, %v1140_v14  ;;  %v287_v23 = vand.u32 4294901760, %v1143_v15  ;;  %v1164_v25 = vsub.f32 %v230_v8, %v1136_v11  ;;  %382 = vmatpush.msra.mxu2 %v1140_v14  ;;  %v1170_v28 = vsub.f32 %v229_v12, %v1148_v17  ;;  %v221_v61 = vld [vmem:[#allocation5 + $0x8] sm:$0xff]  ;;  %v220_v2 = vld [vmem:[#allocation5] sm:$0xff]  ;;  %s930_s30 = scalar_lea.hbm %s929_s29, 8  ;;  %s934_s17 = scalar_lea.hbm %s1403_s3, 16 }
  0x36   : > { %v293_v24 = vand.u32 4294901760, %v1146_v16  ;;  %v299_v26 = vand.u32 4294901760, %v1152_v18  ;;  %v305_v27 = vand.u32 4294901760, %v1155_v19  ;;  %437 = vmatpush.msra.mxu3 %v1128_v4  ;;  %v1183_v32 = vand.u32 4294901760, %v227_v21  ;;  %p931_p1 = scmp.ne.s32.totalorder %s929_s29, %s930_s30  ;;  %p935_p12 = scmp.lt.s32.totalorder %s929_s29, %s1403_s3 }
  0x37   : > { %v282_v29 = vsub.f32 %v1140_v14, %v281_v22  ;;  %243 = vmatpush.msra.mxu0 %v1130_v5  ;;  %v288_v30 = vsub.f32 %v1143_v15, %v287_v23  ;;  %385 = vmatpush.msra.mxu2 %v1143_v15  ;;  %v1187_v33 = vsub.f32 %v228_v13, %v1157_v20  ;;  %v311_v39 = vand.u32 4294901760, %v1164_v25  ;;  %p936_p7 = scmp.lt.s32.totalorder %s934_s17, %s930_s30 }
  0x38   : > { %v294_v31 = vsub.f32 %v1146_v16, %v293_v24  ;;  %439 = vmatpush.msra.mxu3 %v1130_v5  ;;  %v300_v38 = vsub.f32 %v1152_v18, %v299_v26  ;;  %v306_v40 = vsub.f32 %v1155_v19, %v305_v27  ;;  %v317_v41 = vand.u32 4294901760, %v1170_v28  ;;  %p932_p3 = pnand %p931_p1, %p1079_p4 }
  0x39   : > { %v283_v36 = vand.u32 4294901760, %v282_v29  ;;  %v289_v37 = vand.u32 4294901760, %v288_v30  ;;  %245 = vmatpush.msra.mxu0 %v1132_v9  ;;  %388 = vmatpush.msra.mxu2 %v1146_v16  ;;  %v1202_v44 = vand.u32 4294901760, %v226_v34  ;;  %v1205_v45 = vsub.f32 %v227_v21, %v1183_v32  ;;  %v219_v29 = vld [vmem:[%s1116_s23] sm:$0xff]  ;;  %p937_p8 = por %p936_p7, %p935_p12 }
  0x3a   : > { %441 = vmatpush.msra.mxu3 %v1132_v9  ;;  %v295_v43 = vand.u32 4294901760, %v294_v31  ;;  %v1207_v46 = vand.u32 4294901760, %v225_v35  ;;  %v323_v48 = vand.u32 4294901760, %v1187_v33  ;;  %v301_v49 = vand.u32 4294901760, %v300_v38  ;;  %p933_p5 = pneg %p932_p3 }
  0x3b   : > { %284 = vmatpush.msra.mxu1 %v283_v36  ;;  %247 = vmatpush.msra.mxu0 %v1134_v10  ;;  %v312_v50 = vsub.f32 %v1164_v25, %v311_v39  ;;  %v1217_v51 = vsub.f32 %v226_v34, %v1202_v44  ;;  %v1219_v52 = vand.u32 4294901760, %v224_v42  ;;  %v1221_v54 = vand.u32 4294901760, %v223_v47 }
  0x3c   : > { %391 = vmatpush.msra.mxu2 %v1152_v18  ;;  %443 = vmatpush.msra.mxu3 %v1134_v10  ;;  %v307_v55 = vand.u32 4294901760, %v306_v40  ;;  %v318_v56 = vsub.f32 %v1170_v28, %v317_v41  ;;  %v329_v57 = vand.u32 4294901760, %v1205_v45  ;;  %v1231_v58 = vsub.f32 %v225_v35, %v1207_v46  ;;  %p938_p9 = pnand %p937_p8, %p933_p5 }
  0x3d   : > { %290 = vmatpush.msra.mxu1 %v289_v37  ;;  %249 = vmatpush.msra.mxu0 %v1136_v11  ;;  %v324_v59 = vsub.f32 %v1187_v33, %v323_v48  ;;  %v1236_v60 = vand.u32 4294901760, %v222_v53  ;;  %v313_v62 = vand.u32 4294901760, %v312_v50  ;;  %v335_v63 = vand.u32 4294901760, %v1217_v51 }
  0x3e   : > { %394 = vmatpush.msra.mxu2 %v1155_v19  ;;  %445 = vmatpush.msra.mxu3 %v1136_v11  ;;  %v1243_v0 = vsub.f32 %v224_v42, %v1219_v52  ;;  %v1246_v1 = vsub.f32 %v223_v47, %v1221_v54  ;;  %v319_v6 = vand.u32 4294901760, %v318_v56  ;;  %v330_v7 = vsub.f32 %v1205_v45, %v329_v57 }
  0x3f   : > { %296 = vmatpush.msra.mxu1 %v295_v43  ;;  %251 = vmatpush.msra.mxu0 %v1148_v17  ;;  %v341_v8 = vand.u32 4294901760, %v1231_v58  ;;  %v1255_v12 = vand.u32 4294901760, %v221_v61  ;;  %v325_v13 = vand.u32 4294901760, %v324_v59  ;;  %v1258_v21 = vsub.f32 %v222_v53, %v1236_v60 }
  0x40   : > { %397 = vmatpush.msra.mxu2 %v1164_v25  ;;  %447 = vmatpush.msra.mxu3 %v1148_v17  ;;  %v336_v30 = vsub.f32 %v1217_v51, %v335_v63  ;;  %v347_v31 = vand.u32 4294901760, %v1243_v0  ;;  %v1268_v34 = vand.u32 4294901760, %v220_v2  ;;  %v1270_v35 = vand.u32 4294901760, %v219_v29 }
  0x41   : > { %302 = vmatpush.msra.mxu1 %v301_v49  ;;  %253 = vmatpush.msra.mxu0 %v1157_v20  ;;  %v353_v36 = vand.u32 4294901760, %v1246_v1  ;;  %v331_v37 = vand.u32 4294901760, %v330_v7  ;;  %v342_v38 = vsub.f32 %v1231_v58, %v341_v8  ;;  %v1280_v40 = vsub.f32 %v221_v61, %v1255_v12 }
  0x42   : > { %400 = vmatpush.msra.mxu2 %v1170_v28  ;;  %449 = vmatpush.msra.mxu3 %v1157_v20  ;;  %v271_v42 = vsub.f32 %v219_v29, %v1270_v35  ;;  %v337_v43 = vand.u32 4294901760, %v336_v30  ;;  %v348_v47 = vsub.f32 %v1243_v0, %v347_v31  ;;  %v359_v49 = vand.u32 4294901760, %v1258_v21 }
  0x43   : > { %308 = vmatpush.msra.mxu1 %v307_v55  ;;  %255 = vmatpush.msra.mxu0 %v1183_v32  ;;  %v1291_v50 = vsub.f32 %v220_v2, %v1268_v34  ;;  %v343_v53 = vand.u32 4294901760, %v342_v38  ;;  %v354_v55 = vsub.f32 %v1246_v1, %v353_v36  ;;  %v365_v56 = vand.u32 4294901760, %v1280_v40 }
  0x44   : > { %403 = vmatpush.msra.mxu2 %v1187_v33  ;;  %451 = vmatpush.msra.mxu3 %v1183_v32  ;;  %v272_v59 = vand.u32 4294901760, %v271_v42  ;;  %v349_v61 = vand.u32 4294901760, %v348_v47 }
  0x45   : > { %314 = vmatpush.msra.mxu1 %v313_v62  ;;  %257 = vmatpush.msra.mxu0 %v1202_v44  ;;  %v360_v62 = vsub.f32 %v1258_v21, %v359_v49  ;;  %v371_v2 = vand.u32 4294901760, %v1291_v50  ;;  %v366_v7 = vsub.f32 %v1280_v40, %v365_v56 }
  0x46   : > { %406 = vmatpush.msra.mxu2 %v1205_v45  ;;  %453 = vmatpush.msra.mxu3 %v1202_v44 }
  0x47   : > { %320 = vmatpush.msra.mxu1 %v319_v6  ;;  %259 = vmatpush.msra.mxu0 %v1207_v46  ;;  %v355_v6 = vand.u32 4294901760, %v354_v55  ;;  %v361_v29 = vand.u32 4294901760, %v360_v62  ;;  %v372_v30 = vsub.f32 %v1291_v50, %v371_v2 }
  0x48   : > { %409 = vmatpush.msra.mxu2 %v1217_v51  ;;  %455 = vmatpush.msra.mxu3 %v1207_v46 }
  0x49   : > { %326 = vmatpush.msra.mxu1 %v325_v13  ;;  %261 = vmatpush.msra.mxu0 %v1219_v52  ;;  %v273_v13 = vsub.f32 %v271_v42, %v272_v59 }
  0x4a   : > { %412 = vmatpush.msra.mxu2 %v1231_v58  ;;  %457 = vmatpush.msra.mxu3 %v1219_v52 }
  0x4b   : > { %332 = vmatpush.msra.mxu1 %v331_v37  ;;  %263 = vmatpush.msra.mxu0 %v1221_v54  ;;  %v367_v37 = vand.u32 4294901760, %v366_v7  ;;  %v274_v38 = vand.u32 4294901760, %v273_v13 }
  0x4c   : > { %415 = vmatpush.msra.mxu2 %v1243_v0  ;;  %459 = vmatpush.msra.mxu3 %v1221_v54 }
  0x4d   : > { %338 = vmatpush.msra.mxu1 %v337_v43  ;;  %265 = vmatpush.msra.mxu0 %v1236_v60  ;;  %v373_v43 = vand.u32 4294901760, %v372_v30 }
  0x4e   : > { %418 = vmatpush.msra.mxu2 %v1246_v1  ;;  %461 = vmatpush.msra.mxu3 %v1236_v60 }
  0x4f   : > { %344 = vmatpush.msra.mxu1 %v343_v53  ;;  %267 = vmatpush.msra.mxu0 %v1255_v12 }
  0x50   : > { %421 = vmatpush.msra.mxu2 %v1258_v21  ;;  %463 = vmatpush.msra.mxu3 %v1255_v12 }
  0x51   : > { %350 = vmatpush.msra.mxu1 %v349_v61  ;;  %269 = vmatpush.msra.mxu0 %v1268_v34 }
  0x52   : > { %424 = vmatpush.msra.mxu2 %v1280_v40  ;;  %465 = vmatpush.msra.mxu3 %v1268_v34 }
  0x53   : > { %476 = vmatpush.msrb.mxu0 %v281_v22  ;;  %356 = vmatpush.msra.mxu1 %v355_v6 }
  0x54   : > { %427 = vmatpush.msra.mxu2 %v1291_v50  ;;  %469 = vmatmul.f32.vlgmr.msra.gmra.mxu3 %v272_v59 }
  0x55   : > { %480 = vmatpush.msrb.mxu0 %v287_v23  ;;  %362 = vmatpush.msra.mxu1 %v361_v29 }
  0x56   : > { %430 = vmatmul.f32.vlgmr.msra.gmra.mxu2 %v271_v42  ;;  %275 = vmatmul.f32.vlgmr.msra.gmra.mxu0 %v274_v38 }
  0x57   : > { %484 = vmatpush.msrb.mxu0 %v293_v24  ;;  %368 = vmatpush.msra.mxu1 %v367_v37 }
  0x59   : > { %488 = vmatpush.msrb.mxu0 %v299_v26  ;;  %374 = vmatpush.msra.mxu1 %v373_v43 }
  0x5a   : > { %376 = vmatmul.f32.vlgmr.msra.gmra.mxu1 %v1270_v35 }
  0x5b   : > { %543 = vmatpush.msrb.mxu1 %v1126_v3  ;;  %492 = vmatpush.msrb.mxu0 %v305_v27  ;;  %v236_v3 = vld [vmem:[#allocation7] sm:$0x7] }
  0x5c   : > { %v604_v58 = vperm.slane %v236_v3, 2 }
  0x5d   : > { %545 = vmatpush.msrb.mxu1 %v1128_v4  ;;  %496 = vmatpush.msrb.mxu0 %v311_v39  ;;  %v237_v4 = vperm.slane %v236_v3, 0 }
  0x5f   : > { %547 = vmatpush.msrb.mxu1 %v1130_v5  ;;  %500 = vmatpush.msrb.mxu0 %v317_v41 }
  0x61   : > { %549 = vmatpush.msrb.mxu1 %v1132_v9  ;;  %504 = vmatpush.msrb.mxu0 %v323_v48 }
  0x63   : > { %551 = vmatpush.msrb.mxu1 %v1134_v10  ;;  %508 = vmatpush.msrb.mxu0 %v329_v57 }
  0x65   : > { %553 = vmatpush.msrb.mxu1 %v1136_v11  ;;  %512 = vmatpush.msrb.mxu0 %v335_v63 }
  0x67   : > { %555 = vmatpush.msrb.mxu1 %v1148_v17  ;;  %516 = vmatpush.msrb.mxu0 %v341_v8 }
  0x69   : > { %557 = vmatpush.msrb.mxu1 %v1157_v20  ;;  %520 = vmatpush.msrb.mxu0 %v347_v31 }
  0x6b   : > { %559 = vmatpush.msrb.mxu1 %v1183_v32  ;;  %524 = vmatpush.msrb.mxu0 %v353_v36 }
  0x6d   : > { %561 = vmatpush.msrb.mxu1 %v1202_v44  ;;  %528 = vmatpush.msrb.mxu0 %v359_v49 }
  0x6f   : > { %563 = vmatpush.msrb.mxu1 %v1207_v46  ;;  %532 = vmatpush.msrb.mxu0 %v365_v56 }
  0x71   : > { %565 = vmatpush.msrb.mxu1 %v1219_v52  ;;  %536 = vmatpush.msrb.mxu0 %v371_v2  ;;  %v602_v52 = vperm.slane %v236_v3, 1 }
  0x72   : > { %538 = vmatmul.f32.vlgmr.msrb.gmra.mxu0 %v1270_v35 }
  0x73   : > { %567 = vmatpush.msrb.mxu1 %v1221_v54 }
  0x75   : > { %569 = vmatpush.msrb.mxu1 %v1236_v60 }
  0x77   : > { %571 = vmatpush.msrb.mxu1 %v1255_v12 }
  0x79   : > { %573 = vmatpush.msrb.mxu1 %v1268_v34 }
  0x7a   : > { %575 = vmatmul.f32.vlgmr.msrb.gmra.mxu1 %v1270_v35 }
  0xd3   : > { %v276_v5 = vpop.f32.mrf.mxu0 }
  0xd4   : > { %v277_v9 = vadd.f32 %v276_v5, %v237_v4 }
  0xd7   : > { %v377_v10 = vpop.f32.mrf.mxu1  ;;  %v470_v16 = vpop.f32.mrf.mxu3 }
  0xd8   : > { %v378_v11 = vadd.f32 %v377_v10, %v277_v9 }
  0xd9   : > { %v431_v14 = vpop.f32.mrf.mxu2 }
  0xda   : > { %v432_v15 = vadd.f32 %v431_v14, %v378_v11 }
  0xdc   : > { %v471_v17 = vadd.f32 %v470_v16, %v432_v15 }
  0xef   : > { %v539_v18 = vpop.f32.mrf.mxu0 }
  0xf0   : > { %v540_v19 = vadd.f32 %v539_v18, %v471_v17 }
  0xf7   : > { %v576_v20 = vpop.f32.mrf.mxu1 }
  0xf8   : > { %v577_v22 = vadd.f32 %v576_v20, %v540_v19 }
  0xfa   : > { %579 = vadd.xlane.f32.xlu0 %v577_v22  ;;  %v581_v23 = vmul.f32 %v577_v22, %v577_v22 }
 0x102   : > { %582 = vadd.xlane.f32.xlu0 %v581_v23 }
 0x16d   : > { %v580_v24 = vpop.xlane.xlu0 %579 }
 0x16e   : > { %v584_v25 = vmul.f32 0.015625, %v580_v24 }
 0x170   : > { %v586_v27 = vmul.f32 %v584_v25, %v584_v25  ;;  %v589_v54 = vsub.f32 %v577_v22, %v584_v25 }
 0x175   : > { %v583_v26 = vpop.xlane.xlu0 %582 }
 0x176   : > { %v585_v28 = vmul.f32 0.015625, %v583_v26 }
 0x178   : > { %v587_v32 = vsub.f32 %v585_v28, %v586_v27 }
 0x17a   : > { %v588_v33 = vmax.f32 %v587_v32, 0.0 }
 0x17c   : > { %v590_v39 = vadd.f32 1e-05, %v588_v33 }
 0x17e   : > { %818 = vrsqrt.f32 %v590_v39  ;;  %vm597_vm1 = vweird.f32 %v590_v39 }
 0x184   : > { %v819_v41 = vpop.eup %818 }
 0x185   : > { %v592_v44 = vmul.f32 %v819_v41, %v590_v39  ;;  %vm598_vm0 = vweird.f32 %v819_v41 }
 0x186   : > { %vm599_vm2 = vmor %vm597_vm1, %vm598_vm0 }
 0x187   : > { %v593_v45 = vmul.f32 %v819_v41, %v592_v44 }
 0x189   : > { %v594_v46 = vmul.f32 0.5, %v593_v45 }
 0x18b   : > { %v595_v48 = vsub.f32 1.5, %v594_v46 }
 0x18d   : > { %v596_v51 = vmul.f32 %v819_v41, %v595_v48 }
 0x18f   : > { %v600_v57 = vsel %vm599_vm2, %v819_v41, %v596_v51 }
 0x190   : > { %v601_v60 = vmul.f32 %v600_v57, %v589_v54 }
 0x192   : > { %v603_v63 = vmul.f32 %v602_v52, %v601_v60 }
 0x194   : > { %v605_v0 = vadd.f32 %v604_v58, %v603_v63 }
 0x196   : > { %v744_v1 = vmul.f32 -1.442695, %v605_v0 }
 0x198   : > { %820 = vpow2.f32 %v744_v1 }
 0x19e   : > { %v821_v8 = vpop.eup %820 }
 0x19f   : > { %v609_v12 = vadd.f32 1.0, %v821_v8 }
 0x1a1   : > { %822 = vrcp.f32 %v609_v12  ;;  %v621_v35 = vand.u32 2147483648, %v609_v12  ;;  %v619_v40 = vand.u32 2147483647, %v609_v12  ;;  %vm615_vm4 = vweird.f32 %v609_v12 }
 0x1a3   : > { %v622_v47 = vor.u32 1.1754944e-38, %v621_v35  ;;  %vm620_vm6 = vcmp.eq.f32.partialorder %v619_v40, 8.507059e+37 }
 0x1a7   : > { %v823_v21 = vpop.eup %822 }
 0x1a8   : > { %v611_v31 = vmul.f32 %v823_v21, %v609_v12  ;;  %vm616_vm3 = vweird.f32 %v823_v21 }
 0x1a9   : > { %vm617_vm5 = vmor %vm615_vm4, %vm616_vm3 }
 0x1aa   : > { %v612_v34 = vsub.f32 1.0, %v611_v31 }
 0x1ac   : > { %v613_v36 = vmul.f32 %v823_v21, %v612_v34 }
 0x1ae   : > { %v614_v42 = vadd.f32 %v823_v21, %v613_v36 }
 0x1b0   : > { %v618_v49 = vsel %vm617_vm5, %v823_v21, %v614_v42 }
 0x1b1   : > { %v623_v50 = vsel %vm620_vm6, %v622_v47, %v618_v49 }
 0x1b2   : > { %v625_v53 = vmul.f32 %v623_v50, %v605_v0 }
 0x1b4   : > { %626 = vst [vmem:[%s218_s26] sm:$0xff] %v625_v53 }
 0x1b5   : > { %941 = shalt.err (!%p938_p9)
}
 0x1b6   : > { %759 = dma.vmem_to_hbm [thread:$0]  (%p1079_p4), %s641_s27, 128, %s643_s28, %s628_s19  }
 0x1b7 PF: > { %s654_s10 = sand.u32 1, %s972_s12   ;;  %p1410_p10 = scmp.ge.s32.totalorder %s984_s15, 2 }
 0x1b8   : > { %s655_s21 = scalar_lea.sflag [#allocation4], %s654_s10 }
 0x1b9   : > { %p773_p13 = pnand %p1410_p10, %p1083_p6 }
 0x1bb   : > { %p774_p11 = pneg %p773_p13 }
 0x1bd   : > { %967 = dma.done.wait (%p774_p11), %s655_s21, 128  }
 0x1be   : > { %969 = vsyncadd (%p774_p11), %s655_s21, 4294967168  ;;  %p17_p0 = scmp.ge.s32.totalorder %s1053_s4, 4   ;;  %s1411_s12 = smov %s976_s13 }
 0x1bf   : > { %s1412_s13 = smov %s980_s14  ;;  %s1413_s14 = smov %s1064_s7 }
 0x1c0   : > { %s1414_s15 = smov %s1053_s4  ;;  %19 = sbr.rel (!%p17_p0) target bundleno = 6 (0x6), region = 85 }
 0x1c5   :  { %661 = vsyncpa [#allocation3], 1 }
 0x1c6   :  { %663 = vsyncpa [#allocation3 + $0x1], 1 }
 0x1c7   :  { %664 = vsyncpa [#allocation6], 1 }
 0x1c8   :  { %665 = vsyncpa [#allocation4], 1 }
 0x1c9   :  { %667 = vsyncpa [#allocation4 + $0x1], 1 }

</bundles_post_ra>
